<compile_context>
chip_gen: v6e
topology: v6e:2x2x1
jax: 0.10.0
libtpu: 0.0.40
codegen_flags: <defaults>
</compile_context>

<pallas_src>
import functools

import jax
import jax.numpy as jnp
from jax import lax
from jax.experimental import pallas as pl
from jax.experimental.pallas import tpu as pltpu


# ----------------------------------------------------------------------------
# numerics helpers (overflow-safe, used both in kernels and in the reference)
# ----------------------------------------------------------------------------
def _sigmoid(x):
    e = jnp.exp(-jnp.abs(x))
    return jnp.where(x >= 0, 1.0 / (1.0 + e), e / (1.0 + e))


def _silu(x):
    return x * _sigmoid(x)


def _softplus(x):
    # PyTorch F.softplus with threshold=20 (no inf intermediates)
    return jnp.where(x > 20.0, x, jnp.log1p(jnp.exp(jnp.minimum(x, 20.0))))


def _pick_tile(dim, target, quantum):
    """Largest t <= min(target, dim) with dim % t == 0 and t % quantum == 0, else full dim."""
    t = min(target, dim)
    t -= t % quantum
    while t >= quantum:
        if dim % t == 0:
            return t
        t -= quantum
    return dim


# ----------------------------------------------------------------------------
# blocked matmul (all dense projections)
# ----------------------------------------------------------------------------
def _linear_kernel(nk, has_bias, compute_dtype, *refs):
    if has_bias:
        x_ref, w_ref, b_ref, o_ref, acc_ref = refs
    else:
        x_ref, w_ref, o_ref, acc_ref = refs
        b_ref = None
    k = pl.program_id(2)

    @pl.when(k == 0)
    def _():
        acc_ref[...] = jnp.zeros_like(acc_ref)

    acc_ref[...] += jnp.dot(
        x_ref[...].astype(compute_dtype),
        w_ref[...].astype(compute_dtype),
        preferred_element_type=jnp.float32,
    )

    @pl.when(k == nk - 1)
    def _():
        out = acc_ref[...]
        if has_bias:
            out = out + b_ref[...].astype(jnp.float32)
        o_ref[...] = out.astype(o_ref.dtype)


def linear(x, w, b=None, *, compute_dtype=jnp.float32,
           tm_target=256, tn_target=512, tk_target=512):
    """x: (M, K) @ w: (K, N) (+ optional bias (1, N)) -> (M, N), tiled MXU matmul.

    Tile targets keep 2 inputs x 2 buffers + f32 accumulator well under the
    scoped-VMEM defaults on v5e/v6e/v7x while filling the MXU.
    """
    M, K = x.shape
    K2, N = w.shape
    assert K == K2
    tm = _pick_tile(M, tm_target, 8)
    tn = _pick_tile(N, tn_target, 128)
    tk = _pick_tile(K, tk_target, 128)
    nk = K // tk
    grid = (M // tm, N // tn, nk)
    has_bias = b is not None

    in_specs = [
        pl.BlockSpec((tm, tk), lambda i, j, k: (i, k)),
        pl.BlockSpec((tk, tn), lambda i, j, k: (k, j)),
    ]
    args = [x, w]
    if has_bias:
        in_specs.append(pl.BlockSpec((1, tn), lambda i, j, k: (0, j)))
        args.append(b)

    kern = functools.partial(_linear_kernel, nk, has_bias, compute_dtype)
    return pl.pallas_call(
        kern,
        out_shape=jax.ShapeDtypeStruct((M, N), x.dtype),
        grid=grid,
        in_specs=in_specs,
        out_specs=pl.BlockSpec((tm, tn), lambda i, j, k: (i, j)),
        scratch_shapes=[pltpu.VMEM((tm, tn), jnp.float32)],
        compiler_params=pltpu.CompilerParams(
            dimension_semantics=("parallel", "parallel", "arbitrary")),
    )(*args)


# ----------------------------------------------------------------------------
# fused (residual add +) LayerNorm, row-tiled
# ----------------------------------------------------------------------------
def _add_ln_kernel(eps, with_add, *refs):
    if with_add:
        x_ref, r_ref, w_ref, b_ref, y_ref, res_ref = refs
        resid = x_ref[...].astype(jnp.float32) + r_ref[...].astype(jnp.float32)
    else:
        x_ref, w_ref, b_ref, y_ref, res_ref = refs
        resid = x_ref[...].astype(jnp.float32)
    mean = jnp.mean(resid, axis=-1, keepdims=True)
    cen = resid - mean
    var = jnp.mean(cen * cen, axis=-1, keepdims=True)
    y = cen * lax.rsqrt(var + eps) * w_ref[...].astype(jnp.float32) \
        + b_ref[...].astype(jnp.float32)
    y_ref[...] = y.astype(y_ref.dtype)
    res_ref[...] = resid.astype(res_ref.dtype)


def add_layernorm(x, res, w, b, eps, *, tm_target=256):
    """residual = x (+ res if res is not None); y = LayerNorm(residual). Returns (y, residual)."""
    B, L, D = x.shape
    M = B * L
    tm = _pick_tile(M, tm_target, 8)   # 256-row tiles fit 2in+2out double-buffered on all gens
    grid = (M // tm,)
    with_add = res is not None

    in_specs = [pl.BlockSpec((tm, D), lambda i: (i, 0))]
    args = [x.reshape(M, D)]
    if with_add:
        in_specs.append(pl.BlockSpec((tm, D), lambda i: (i, 0)))
        args.append(res.reshape(M, D))
    in_specs += [pl.BlockSpec((1, D), lambda i: (0, 0)),
                 pl.BlockSpec((1, D), lambda i: (0, 0))]
    args += [w, b]

    kern = functools.partial(_add_ln_kernel, eps, with_add)
    y, r = pl.pallas_call(
        kern,
        out_shape=(jax.ShapeDtypeStruct((M, D), x.dtype),
                   jax.ShapeDtypeStruct((M, D), x.dtype)),
        grid=grid,
        in_specs=in_specs,
        out_specs=(pl.BlockSpec((tm, D), lambda i: (i, 0)),
                   pl.BlockSpec((tm, D), lambda i: (i, 0))),
        compiler_params=pltpu.CompilerParams(dimension_semantics=("parallel",)),
    )(*args)
    return y.reshape(B, L, D), r.reshape(B, L, D)


# ----------------------------------------------------------------------------
# causal depthwise conv1d (k = d_conv) + SiLU, channel-tiled
# ----------------------------------------------------------------------------
def _conv_silu_kernel(d_conv, x_ref, w_ref, b_ref, o_ref):
    x = x_ref[...].astype(jnp.float32)                # (1, L, TC)
    w = w_ref[...].astype(jnp.float32)                # (d_conv, TC)
    acc = x * w[d_conv - 1:d_conv, :] + b_ref[...].astype(jnp.float32)   # shift-0 tap + bias
    L = x.shape[1]
    t_idx = lax.broadcasted_iota(jnp.int32, (1, L, 1), 1)   # column mask, broadcast over lanes
    for k in range(d_conv - 1):
        shift = d_conv - 1 - k                        # out[t] += w[k] * x[t - shift]
        xs = pltpu.roll(x, shift, axis=1)
        xs = jnp.where(t_idx >= shift, xs, 0.0)       # zero the (shift) wrapped rows only
        acc = acc + xs * w[k:k + 1, :]
    o_ref[...] = _silu(acc).astype(o_ref.dtype)


def conv_silu(x, w, b, *, tc_target=256):
    """x: (B, L, d_inner); w: (d_conv, d_inner); b: (1, d_inner). Depthwise -> channel tiling."""
    B, L, D = x.shape
    d_conv = w.shape[0]
    tc = _pick_tile(D, tc_target, 128)
    grid = (B, D // tc)
    kern = functools.partial(_conv_silu_kernel, d_conv)
    return pl.pallas_call(
        kern,
        out_shape=jax.ShapeDtypeStruct((B, L, D), x.dtype),
        grid=grid,
        in_specs=[
            pl.BlockSpec((1, L, tc), lambda bi, ci: (bi, 0, ci)),
            pl.BlockSpec((d_conv, tc), lambda bi, ci: (0, ci)),
            pl.BlockSpec((1, tc), lambda bi, ci: (0, ci)),
        ],
        out_specs=pl.BlockSpec((1, L, tc), lambda bi, ci: (bi, 0, ci)),
        compiler_params=pltpu.CompilerParams(
            dimension_semantics=("parallel", "parallel")),
    )(x, w, b)


# ----------------------------------------------------------------------------
# selective state-space scan, time-chunked
# ----------------------------------------------------------------------------
def _scan_kernel(TL, hoist_da, u_ref, dt_ref, z_ref, bt_ref, ct_ref, a_ref, d_ref,
                 o_ref, state, du_buf, y_buf, aux_buf):
    c = pl.program_id(1)

    @pl.when(c == 0)                     # new batch row -> reset carried SSM state
    def _():
        state[...] = jnp.zeros_like(state)

    # ---- hoisted chunk-level (vectorized) work ----
    delta = _softplus(dt_ref[...].astype(jnp.float32))       # (TL, d_inner)
    du_buf[...] = delta * u_ref[...].astype(jnp.float32)
    A = a_ref[...].astype(jnp.float32)                       # (d_state, d_inner), loop-invariant

    if hoist_da:
        # exp(delta ⊗ A) for the whole chunk -> EUP work runs vectorized, off the
        # serial recurrence critical path.   aux_buf: (TL, d_state, d_inner)
        aux_buf[...] = jnp.exp(delta[:, None, :] * A[None, :, :])
    else:
        # fallback: keep softplus(dt) for per-step exp.       aux_buf: (TL, d_inner)
        aux_buf[...] = delta

    Bt = bt_ref[...].astype(jnp.float32)                     # (d_state, TL), time on lanes
    Ct = ct_ref[...].astype(jnp.float32)                     # (d_state, TL)
    lane_t = lax.broadcasted_iota(jnp.int32, (1, TL), 1)

    def step(t, carry):
        onehot = lane_t == t                                               # (1, TL)
        b_col = jnp.sum(jnp.where(onehot, Bt, 0.0), axis=1, keepdims=True)  # (d_state, 1)
        c_col = jnp.sum(jnp.where(onehot, Ct, 0.0), axis=1, keepdims=True)  # (d_state, 1)
        du_row = du_buf[pl.ds(t, 1), :]                                    # (1, d_inner)
        if hoist_da:
            dA = aux_buf[t]                                                # (d_state, d_inner)
        else:
            dA = jnp.exp(aux_buf[pl.ds(t, 1), :] * A)
        new_state = dA * state[...] + b_col * du_row
        state[...] = new_state
        y_buf[pl.ds(t, 1), :] = jnp.sum(new_state * c_col, axis=0, keepdims=True)
        return carry

    lax.fori_loop(0, TL, step, 0, unroll=min(TL, 8))

    # ---- epilogue (vectorized over the chunk): D-skip and SiLU(z) gate ----
    u = u_ref[...].astype(jnp.float32)
    z = z_ref[...].astype(jnp.float32)
    y = y_buf[...] + u * d_ref[...].astype(jnp.float32)
    o_ref[...] = (y * _silu(z)).astype(o_ref.dtype)


def _selective_scan_call(u, dt, z, Bt, Ct, A_T, D_row, TL, hoist_da):
    Bsz, L, d_inner = u.shape
    d_state = A_T.shape[0]
    nchunks = L // TL

    spec_di = pl.BlockSpec((None, TL, d_inner), lambda b, c: (b, c, 0))
    spec_ds = pl.BlockSpec((None, d_state, TL), lambda b, c: (b, 0, c))
    spec_a = pl.BlockSpec((d_state, d_inner), lambda b, c: (0, 0))
    spec_d = pl.BlockSpec((1, d_inner), lambda b, c: (0, 0))

    aux_scratch = (pltpu.VMEM((TL, d_state, d_inner), jnp.float32) if hoist_da
                   else pltpu.VMEM((TL, d_inner), jnp.float32))

    kern = functools.partial(_scan_kernel, TL, hoist_da)
    return pl.pallas_call(
        kern,
        out_shape=jax.ShapeDtypeStruct((Bsz, L, d_inner), u.dtype),
        grid=(Bsz, nchunks),
        in_specs=[spec_di, spec_di, spec_di, spec_ds, spec_ds, spec_a, spec_d],
        out_specs=spec_di,
        scratch_shapes=[
            pltpu.VMEM((d_state, d_inner), jnp.float32),   # carried SSM state
            pltpu.VMEM((TL, d_inner), jnp.float32),        # delta * u
            pltpu.VMEM((TL, d_inner), jnp.float32),        # per-chunk y
            aux_scratch,                                   # exp(delta⊗A) or softplus(dt)
        ],
        compiler_params=pltpu.CompilerParams(
            dimension_semantics=("parallel", "arbitrary")),   # batch parallel (2 TCs on v7x)
    )(u, dt, z, Bt, Ct, A_T, D_row)


# None = not yet probed; True/False after the first (eager) call.
_HOIST_DA = None


def selective_scan(u, dt, z, Bm, Cm, A_T, D_row, *, tl_target=128,
                   da_budget_bytes=4 << 20):
    """u/dt/z: (B, L, d_inner); Bm/Cm: (B, L, d_state); A_T: (d_state, d_inner); D_row: (1, d_inner)."""
    global _HOIST_DA
    Bsz, L, d_inner = u.shape
    d_state = A_T.shape[0]

    # Cap the chunk length so the per-chunk exp(delta⊗A) scratch stays within budget.
    per_step_bytes = max(1, d_state * d_inner * 4)
    tl_cap = max(8, (da_budget_bytes // per_step_bytes) // 8 * 8)
    TL = _pick_tile(L, min(tl_target, tl_cap), 8)

    # Time-on-lanes layout for per-step B_t / C_t columns (lane-dense blocks).
    Bt = jnp.swapaxes(Bm, 1, 2)          # (B, d_state, L)
    Ct = jnp.swapaxes(Cm, 1, 2)

    if _HOIST_DA is None:
        # Probe the exp-hoisted variant once (eager call => lowering errors surface here);
        # fall back to the per-step-exp kernel if it does not lower on this toolchain.
        try:
            out = jax.block_until_ready(
                _selective_scan_call(u, dt, z, Bt, Ct, A_T, D_row, TL, True))
            _HOIST_DA = True
            return out
        except Exception:
            _HOIST_DA = False
    if _HOIST_DA:
        return _selective_scan_call(u, dt, z, Bt, Ct, A_T, D_row, TL, True)
    return _selective_scan_call(u, dt, z, Bt, Ct, A_T, D_row, TL, False)


# ----------------------------------------------------------------------------
# model built from the kernels
# ----------------------------------------------------------------------------
def mamba_mixer(h, lp, cfg, compute_dtype):
    B, L, Dm = h.shape
    d_inner = cfg["expand"] * Dm
    d_state = cfg["d_state"]
    dt_rank = cfg["dt_rank"]

    h2 = h.reshape(B * L, Dm)
    xz = linear(h2, lp["in_proj_w"], None, compute_dtype=compute_dtype)
    x = xz[:, :d_inner].reshape(B, L, d_inner)
    z = xz[:, d_inner:].reshape(B, L, d_inner)

    x = conv_silu(x, lp["conv_w"], lp["conv_b"])

    x_dbl = linear(x.reshape(B * L, d_inner), lp["x_proj_w"], None,
                   compute_dtype=compute_dtype)
    dtr = x_dbl[:, :dt_rank]
    Bm = x_dbl[:, dt_rank:dt_rank + d_state].reshape(B, L, d_state)
    Cm = x_dbl[:, dt_rank + d_state:].reshape(B, L, d_state)
    dt = linear(dtr, lp["dt_proj_w"], lp["dt_proj_b"],
                compute_dtype=compute_dtype).reshape(B, L, d_inner)

    A_T = -jnp.exp(lp["A_log"]).T                      # (d_state, d_inner)
    y = selective_scan(x, dt, z, Bm, Cm, A_T, lp["D"])
    out = linear(y.reshape(B * L, d_inner), lp["out_proj_w"], None,
                 compute_dtype=compute_dtype)
    return out.reshape(B, L, Dm)


def mamba_model_forward(params, x, cfg, compute_dtype=jnp.float32):
    B, L, Din = x.shape
    Dm = params["embed_w"].shape[1]
    eps = cfg["eps"]

    h = linear(x.reshape(B * L, Din), params["embed_w"], params["embed_b"],
               compute_dtype=compute_dtype).reshape(B, L, Dm)

    residual = None                                    # first layer: residual = hidden_states
    for lp in params["layers"]:
        normed, residual = add_layernorm(h, residual, lp["norm_w"], lp["norm_b"], eps)
        h = mamba_mixer(normed, lp, cfg, compute_dtype)

    out, _ = add_layernorm(h, residual, params["norm_f_w"], params["norm_f_b"], eps)
    return out


# ----------------------------------------------------------------------------
# pure-JAX reference (same math, no Pallas) for the sanity check
# ----------------------------------------------------------------------------
def _mixer_ref(h, lp, cfg):
    B, L, Dm = h.shape
    d_inner = cfg["expand"] * Dm
    d_state = cfg["d_state"]
    d_conv = cfg["d_conv"]
    dt_rank = cfg["dt_rank"]

    xz = h.reshape(B * L, Dm) @ lp["in_proj_w"]
    x = xz[:, :d_inner].reshape(B, L, d_inner)
    z = xz[:, d_inner:].reshape(B, L, d_inner)

    acc = jnp.zeros_like(x) + lp["conv_b"]
    for k in range(d_conv):
        shift = d_conv - 1 - k
        if shift == 0:
            xs = x
        else:
            xs = jnp.concatenate(
                [jnp.zeros((B, shift, d_inner), x.dtype), x[:, :L - shift]], axis=1)
        acc = acc + xs * lp["conv_w"][k][None, None, :]
    x = acc * _sigmoid(acc)

    x_dbl = x.reshape(B * L, d_inner) @ lp["x_proj_w"]
    dtr = x_dbl[:, :dt_rank]
    Bm = x_dbl[:, dt_rank:dt_rank + d_state].reshape(B, L, d_state)
    Cm = x_dbl[:, dt_rank + d_state:].reshape(B, L, d_state)
    dt = (dtr @ lp["dt_proj_w"] + lp["dt_proj_b"]).reshape(B, L, d_inner)

    A = -jnp.exp(lp["A_log"])                          # (d_inner, d_state)
    delta = _softplus(dt)

    def step(state, inputs):
        u_t, d_t, B_t, C_t = inputs
        dA = jnp.exp(d_t[..., None] * A[None])
        dBu = d_t[..., None] * B_t[:, None, :] * u_t[..., None]
        state = dA * state + dBu
        y = jnp.sum(state * C_t[:, None, :], axis=-1)
        return state, y

    init = jnp.zeros((B, d_inner, d_state), jnp.float32)
    _, ys = lax.scan(step, init,
                     (jnp.moveaxis(x, 1, 0), jnp.moveaxis(delta, 1, 0),
                      jnp.moveaxis(Bm, 1, 0), jnp.moveaxis(Cm, 1, 0)))
    y = jnp.moveaxis(ys, 0, 1)
    y = y + x * lp["D"]
    y = y * (z * _sigmoid(z))
    return (y.reshape(B * L, d_inner) @ lp["out_proj_w"]).reshape(B, L, Dm)


def _add_ln_ref(x, res, w, b, eps):
    r = x + res
    mean = jnp.mean(r, axis=-1, keepdims=True)
    var = jnp.mean((r - mean) ** 2, axis=-1, keepdims=True)
    return (r - mean) / jnp.sqrt(var + eps) * w + b, r


def mamba_model_reference(params, x, cfg):
    B, L, Din = x.shape
    Dm = params["embed_w"].shape[1]
    eps = cfg["eps"]
    h = (x.reshape(B * L, Din) @ params["embed_w"] + params["embed_b"]).reshape(B, L, Dm)
    residual = jnp.zeros_like(h)
    for lp in params["layers"]:
        normed, residual = _add_ln_ref(h, residual, lp["norm_w"], lp["norm_b"], eps)
        h = _mixer_ref(normed, lp, cfg)
    out, _ = _add_ln_ref(h, residual, params["norm_f_w"], params["norm_f_b"], eps)
    return out


# ----------------------------------------------------------------------------
# deterministic synthetic parameters
# ----------------------------------------------------------------------------
def init_params(key, input_dim, model_dim, nlayers, d_state, d_conv, expand, dt_rank):
    d_inner = expand * model_dim
    keys = list(jax.random.split(key, 8 * nlayers + 8))
    kit = iter(keys)

    def rnd(shape, scale):
        return jax.random.normal(next(kit), shape, jnp.float32) * scale

    params = {
        "embed_w": rnd((input_dim, model_dim), 1.0 / jnp.sqrt(input_dim)),
        "embed_b": rnd((1, model_dim), 0.02),
        "norm_f_w": jnp.ones((1, model_dim), jnp.float32),
        "norm_f_b": jnp.zeros((1, model_dim), jnp.float32),
        "layers": [],
    }
    for _ in range(nlayers):
        A_init = jnp.tile(jnp.arange(1, d_state + 1, dtype=jnp.float32)[None, :],
                          (d_inner, 1))
        lp = {
            "norm_w": jnp.ones((1, model_dim), jnp.float32),
            "norm_b": jnp.zeros((1, model_dim), jnp.float32),
            "in_proj_w": rnd((model_dim, 2 * d_inner), 1.0 / jnp.sqrt(model_dim)),
            "conv_w": rnd((d_conv, d_inner), 0.3),
            "conv_b": rnd((1, d_inner), 0.02),
            "x_proj_w": rnd((d_inner, dt_rank + 2 * d_state), 1.0 / jnp.sqrt(d_inner)),
            "dt_proj_w": rnd((dt_rank, d_inner), 1.0 / jnp.sqrt(dt_rank)),
            "dt_proj_b": rnd((1, d_inner), 0.1),
            "A_log": jnp.log(A_init),                  # (d_inner, d_state)
            "D": jnp.ones((1, d_inner), jnp.float32),
            "out_proj_w": rnd((d_inner, model_dim), 1.0 / jnp.sqrt(d_inner)),
        }
        params["layers"].append(lp)
    return params


# ----------------------------------------------------------------------------
# main
# ----------------------------------------------------------------------------
if __name__ == "__main__":
    B, L = 2, 8
    input_dim, model_dim, nlayers = 16, 32, 2
    cfg = dict(
        d_state=16,
        d_conv=4,
        expand=2,
        dt_rank=max(1, -(-model_dim // 16)),   # ceil(model_dim / 16)
        eps=1e-5,
    )

    key = jax.random.PRNGKey(0)
    k_params, k_x = jax.random.split(key)
    params = init_params(k_params, input_dim, model_dim, nlayers,
                         cfg["d_state"], cfg["d_conv"], cfg["expand"], cfg["dt_rank"])
    x = jax.random.normal(k_x, (B, L, input_dim), jnp.float32)

    ref = mamba_model_reference(params, x, cfg)

    # f32 path (exact semantics of the original module)
    out = jax.block_until_ready(mamba_model_forward(params, x, cfg, jnp.float32))
    assert out.shape == (B, L, model_dim)
    assert bool(jnp.allclose(out, ref, rtol=1e-2, atol=1e-2))

    # bf16-MXU path (matmul operands cast to bf16, f32 accumulation) -- looser tolerance
    out_bf16 = jax.block_until_ready(mamba_model_forward(params, x, cfg, jnp.bfloat16))
    assert bool(jnp.allclose(out_bf16, ref, rtol=1e-1, atol=1e-1))

    print("KERNEL_OK")
</pallas_src>

<mosaic_0001>
module attributes {stable_mosaic.version = 11 : i64} {
  func.func @_linear_kernel(%arg0: i32, %arg1: i32, %arg2: i32, %arg3: memref<16x16xf32, #tpu.memory_space<vmem>>, %arg4: memref<16x32xf32, #tpu.memory_space<vmem>>, %arg5: memref<1x32xf32, #tpu.memory_space<vmem>>, %arg6: memref<16x32xf32, #tpu.memory_space<vmem>>, %arg7: memref<16x32xf32, #tpu.memory_space<vmem>>) attributes {dimension_semantics = [#tpu.dimension_semantics<parallel>, #tpu.dimension_semantics<parallel>, #tpu.dimension_semantics<arbitrary>], iteration_bounds = array<i64: 1, 1, 1>, scalar_prefetch = 0 : i64, scratch_operands = 1 : i64, tpu.core_type = #tpu.core_type<tc>, window_params = [{transform_indices = @transform_0, window_bounds = array<i64: 16, 16>}, {transform_indices = @transform_1, window_bounds = array<i64: 16, 32>}, {transform_indices = @transform_2, window_bounds = array<i64: 1, 32>}, {transform_indices = @transform_3, window_bounds = array<i64: 16, 32>}]} {
    %c0_i32 = arith.constant 0 : i32
    %0 = arith.cmpi eq, %arg2, %c0_i32 : i32
    %1 = arith.extui %0 : i1 to i32
    %c0_i32_0 = arith.constant 0 : i32
    %2 = arith.cmpi ne, %1, %c0_i32_0 : i32
    scf.if %2 {
      %cst_10 = arith.constant 0.000000e+00 : f32
      %12 = vector.broadcast %cst_10 : f32 to vector<16x32xf32>
      %c0_11 = arith.constant 0 : index
      %c0_12 = arith.constant 0 : index
      %13 = vector.load %arg7[%c0_11, %c0_12] : memref<16x32xf32, #tpu.memory_space<vmem>>, vector<16x32xf32>
      tpu.vector_store %arg7[%c0_11, %c0_12], %12 {strides = array<i32>} : memref<16x32xf32, #tpu.memory_space<vmem>>, vector<16x32xf32>,
    } else {
    }
    %c0 = arith.constant 0 : index
    %c0_1 = arith.constant 0 : index
    %3 = vector.load %arg7[%c0, %c0_1] : memref<16x32xf32, #tpu.memory_space<vmem>>, vector<16x32xf32>
    %c0_2 = arith.constant 0 : index
    %c0_3 = arith.constant 0 : index
    %4 = vector.load %arg3[%c0_2, %c0_3] : memref<16x16xf32, #tpu.memory_space<vmem>>, vector<16x16xf32>
    %c0_4 = arith.constant 0 : index
    %c0_5 = arith.constant 0 : index
    %5 = vector.load %arg4[%c0_4, %c0_5] : memref<16x32xf32, #tpu.memory_space<vmem>>, vector<16x32xf32>
    %cst = arith.constant dense<0.000000e+00> : vector<16x32xf32>
    %6 = tpu.matmul %4, %5, %cst {dimension_numbers = #tpu.dot_dimension_numbers<[1], [0], [0], [1], [0, 0, 1, 1], [], []>} : vector<16x16xf32>, vector<16x32xf32>, vector<16x32xf32> -> vector<16x32xf32>
    %7 = arith.addf %3, %6 : vector<16x32xf32>
    %c0_6 = arith.constant 0 : index
    %c0_7 = arith.constant 0 : index
    %8 = vector.load %arg7[%c0_6, %c0_7] : memref<16x32xf32, #tpu.memory_space<vmem>>, vector<16x32xf32>
    tpu.vector_store %arg7[%c0_6, %c0_7], %7 {strides = array<i32>} : memref<16x32xf32, #tpu.memory_space<vmem>>, vector<16x32xf32>,
    %c0_i32_8 = arith.constant 0 : i32
    %9 = arith.cmpi eq, %arg2, %c0_i32_8 : i32
    %10 = arith.extui %9 : i1 to i32
    %c0_i32_9 = arith.constant 0 : i32
    %11 = arith.cmpi ne, %10, %c0_i32_9 : i32
    scf.if %11 {
      %c0_10 = arith.constant 0 : index
      %c0_11 = arith.constant 0 : index
      %12 = vector.load %arg7[%c0_10, %c0_11] : memref<16x32xf32, #tpu.memory_space<vmem>>, vector<16x32xf32>
      %c0_12 = arith.constant 0 : index
      %c0_13 = arith.constant 0 : index
      %13 = vector.load %arg5[%c0_12, %c0_13] : memref<1x32xf32, #tpu.memory_space<vmem>>, vector<1x32xf32>
      %14 = vector.broadcast %13 : vector<1x32xf32> to vector<16x32xf32>
      %15 = arith.addf %12, %14 : vector<16x32xf32>
      %c0_14 = arith.constant 0 : index
      %c0_15 = arith.constant 0 : index
      %16 = vector.load %arg6[%c0_14, %c0_15] : memref<16x32xf32, #tpu.memory_space<vmem>>, vector<16x32xf32>
      tpu.vector_store %arg6[%c0_14, %c0_15], %15 {strides = array<i32>} : memref<16x32xf32, #tpu.memory_space<vmem>>, vector<16x32xf32>,
    } else {
    }
    return
  }
  func.func @transform_0(%arg0: i32, %arg1: i32, %arg2: i32) -> (i32, i32) {
    %c0_i32 = arith.constant 0 : i32
    return %arg0, %arg2 : i32, i32
  }
  func.func @transform_1(%arg0: i32, %arg1: i32, %arg2: i32) -> (i32, i32) {
    %c0_i32 = arith.constant 0 : i32
    return %arg2, %arg1 : i32, i32
  }
  func.func @transform_2(%arg0: i32, %arg1: i32, %arg2: i32) -> (i32, i32) {
    %c0_i32 = arith.constant 0 : i32
    %c0_i32_0 = arith.constant 0 : i32
    return %c0_i32, %arg1 : i32, i32
  }
  func.func @transform_3(%arg0: i32, %arg1: i32, %arg2: i32) -> (i32, i32) {
    %c0_i32 = arith.constant 0 : i32
    return %arg0, %arg1 : i32, i32
  }
}

</mosaic_0001>

<bundles_post_ra>
// kernel: tpu_custom_call.1
= control target key start
LH: loop header
LB: loop body
LE: loop exit
PB: predicated region body
PF: predicated region fallthrough
CT: control target
= control target key end

     0   :  { %8 = vsyncpa [#allocation4], 0  ;;  %s316_s0 = inlined_call_operand.hbm [shape: f32[16,16], index: 0, kind: input, shape index: {}]   ;;  %s317_s1 = inlined_call_operand.hbm [shape: f32[16,32], index: 1, kind: input, shape index: {}]   ;;  %s318_s2 = inlined_call_operand.vmem [shape: f32[1,32], index: 2, kind: input, shape index: {}]   ;;  %s319_s3 = inlined_call_operand.hbm [shape: f32[16,32], index: 3, kind: output, shape index: {}]  }
   0x1   :  { %9 = vsyncpa [#allocation7], 0 }
   0x2   :  { %10 = vsyncpa [#allocation5], 0  ;;  %s263_s12 = smov [#allocation3]  }
   0x3   :  { %s16_s13 = sshll.u32 %s263_s12, 4  ;;  %s17_s13 = int_to_ptr.vmem [resolvable:$true] %s16_s13 }
   0x4   :  { %s205_s14 = scalar_lea.vmem %s17_s13, 256  ;;  %p210_p1 = scmp.lt.s32.totalorder %s17_s13, %s17_s13 }
   0x5   :  { %p206_p0 = scmp.ne.s32.totalorder %s17_s13, %s205_s14  ;;  %p211_p2 = scmp.lt.s32.totalorder %s205_s14, %s205_s14 }
   0x7   :  { %p212_p3 = por %p211_p2, %p210_p1 }
   0x9   :  { %p213_p4 = pnand %p212_p3, %p206_p0 }
   0xb   :  { %216 = shalt.err (!%p213_p4)
}
   0xc   :  { %s264_s15 = smov 128   ;;  %s265_s16 = smov 8  }
   0xd   :  { %22 = dma.hbm_to_vmem [thread:$0]  %s316_s0, 256, %s17_s13, [#allocation4], %s264_s15, %s264_s15, %s265_s16  }
   0xe   :  { %s266_s19 = smov [#allocation6]  }
   0xf   :  { %s28_s20 = sshll.u32 %s266_s19, 4  ;;  %s29_s20 = int_to_ptr.vmem [resolvable:$true] %s28_s20 }
  0x10   :  { %s225_s21 = scalar_lea.vmem %s29_s20, 256  ;;  %p230_p6 = scmp.lt.s32.totalorder %s29_s20, %s29_s20 }
  0x11   :  { %p226_p5 = scmp.ne.s32.totalorder %s29_s20, %s225_s21  ;;  %p231_p7 = scmp.lt.s32.totalorder %s225_s21, %s225_s21 }
  0x13   :  { %p232_p8 = por %p231_p7, %p230_p6 }
  0x15   :  { %p233_p9 = pnand %p232_p8, %p226_p5 }
  0x17   :  { %236 = shalt.err (!%p233_p9)
}
  0x18   :  { %34 = dma.hbm_to_vmem [thread:$0]  %s317_s1, 256, %s29_s20, [#allocation7], %s264_s15, %s264_s15, %s265_s16  }
  0x19   :  { %257 = dma.done.wait [#allocation4], 256  }
  0x1a   :  { %258 = vsyncadd [#allocation4], 4294967040 }
  0x1b   :  { %259 = dma.done.wait [#allocation7], 256  }
  0x1c   :  { %260 = vsyncadd [#allocation7], 4294967040  ;;  %vm47_vm0 = vcmask 261120   ;;  %v267_v0 = vmov 0.0   ;;  %vm56_vm1 = vcmask 130048   ;;  %v55_v1 = vld [vmem:[#allocation6 + $0x8] sm:$0xff] }
  0x1d   :  { %49 = vst.msk [vmem:[#allocation2 + $0x8] sm:$0xff] %vm47_vm0, %v267_v0  ;;  %48 = vst.msk [vmem:[#allocation2] sm:$0xff] %vm47_vm0, %v267_v0  ;;  %v54_v2 = vld [vmem:[#allocation6] sm:$0xff]  ;;  %v52_v3 = vld [vmem:[#allocation3] sm:$0xff]  ;;  %184 = vmatprep.subr.mxu0 %v55_v1  ;;  %s268_s24 = smov [#allocation8]  }
  0x1e   :  { %188 = vmatprep.mubr.msk.f32.mxu0 %vm56_vm1, %v52_v3  ;;  %185 = vmatpush3.msra.mxu0 %v55_v1  ;;  %v53_v4 = vld [vmem:[#allocation3 + $0x8] sm:$0xff]  ;;  %v179_v11 = vld [vmem:[%s318_s2] ss:$0 sm:$0xff]  ;;  %s164_s25 = sshll.u32 %s268_s24, 4  ;;  %s165_s25 = int_to_ptr.vmem [resolvable:$true] %s164_s25 }
  0x1f   :  { %186 = vmatprep.subr.mxu0 %v54_v2  ;;  %s237_s26 = scalar_lea.vmem %s165_s25, 256  ;;  %p242_p11 = scmp.lt.s32.totalorder %s165_s25, %s165_s25 }
  0x20   :  { %187 = vmatpush3.msra.mxu0 %v54_v2  ;;  %p238_p10 = scmp.ne.s32.totalorder %s165_s25, %s237_s26  ;;  %p243_p12 = scmp.lt.s32.totalorder %s237_s26, %s237_s26 }
  0x21   :  { %189 = vmatmul.mubr.msk.f32.vlgmr.msra.gmra.mxu0 %vm56_vm1, %v53_v4 }
  0x22   :  { %p244_p13 = por %p243_p12, %p242_p11 }
  0x24   :  { %v51_v5 = vld [vmem:[#allocation2 + $0x8] sm:$0xff]  ;;  %v50_v7 = vld [vmem:[#allocation2] sm:$0xff]  ;;  %p245_p0 = pnand %p244_p13, %p238_p10 }
  0xe1   :  { %v190_v6 = vpop.f32.mrf.mxu0 }
  0xe2   :  { %v139_v8 = vadd.f32 %v190_v6, %v51_v5 }
  0xe3   :  { %v129_v9 = vpop.f32.mrf.mxu0 }
  0xe4   :  { %142 = vst.msk [vmem:[#allocation2 + $0x8] sm:$0xff] %vm47_vm0, %v139_v8  ;;  %v138_v10 = vadd.f32 %v129_v9, %v50_v7 }
  0xe6   :  { %141 = vst.msk [vmem:[#allocation2] sm:$0xff] %vm47_vm0, %v138_v10 }
  0xeb   :  { %v147_v12 = vld [vmem:[#allocation2 + $0x8] sm:$0xff] }
  0xec   :  { %v156_v13 = vadd.f32 %v179_v11, %v147_v12 }
  0xed   :  { %v146_v14 = vld [vmem:[#allocation2] sm:$0xff] }
  0xee   :  { %v155_v15 = vadd.f32 %v179_v11, %v146_v14  ;;  %158 = vst.msk [vmem:[#allocation8 + $0x8] sm:$0xff] %vm47_vm0, %v156_v13 }
  0xf0   :  { %157 = vst.msk [vmem:[#allocation8] sm:$0xff] %vm47_vm0, %v155_v15 }
  0xf1   :  { %248 = shalt.err (!%p245_p0)
}
  0xf2   :  { %170 = dma.vmem_to_hbm [thread:$0]  %s165_s25, 256, %s319_s3, [#allocation5], %s264_s15, %s264_s15, %s265_s16  }
  0xf3   :  { %261 = dma.done.wait [#allocation5], 256  }
  0xf4   :  { %262 = vsyncadd [#allocation5], 4294967040 }
  0xf5   :  { %174 = vsyncpa [#allocation4], 1 }
  0xf6   :  { %175 = vsyncpa [#allocation7], 1 }
  0xf7   :  { %176 = vsyncpa [#allocation5], 1 }

</bundles_post_ra>
